<compile_context>
chip_gen: v6e
topology: v6e:2x2x1
jax: 0.10.0
libtpu: 0.0.40
codegen_flags: <defaults>
</compile_context>

<pallas_src>
import functools
import math

import jax
import jax.numpy as jnp
from jax.experimental import pallas as pl
from jax.experimental.pallas import tpu as pltpu

_VMEM_LIMIT = 64 * 1024 * 1024


# -----------------------------------------------------------------------------
# Tiling helpers
# -----------------------------------------------------------------------------
def _round_up(x, m):
    return ((x + m - 1) // m) * m


def _pick_tile(dim, pref, align):
    """Largest `align`-multiple <= pref that divides dim, else the full dim."""
    if dim <= pref:
        return dim
    t = (pref // align) * align
    while t >= align:
        if dim % t == 0:
            return t
        t -= align
    return dim


def _tile_and_pad(dim, pref, align):
    """Tile <= pref; if no aligned divisor exists, pad `dim` up to a tile multiple."""
    if dim <= pref:
        return dim, 0
    t = (pref // align) * align
    while t >= align:
        if dim % t == 0:
            return t, 0
        t -= align
    t = (pref // align) * align
    return t, (-dim) % t


# -----------------------------------------------------------------------------
# Tiled linear:  out = relu?(x @ W + b)      (K-accumulated in f32 VMEM scratch)
# -----------------------------------------------------------------------------
def _linear_kernel(x_ref, w_ref, b_ref, o_ref, acc_ref, *, relu):
    k = pl.program_id(2)

    @pl.when(k == 0)
    def _():
        acc_ref[...] = jnp.zeros_like(acc_ref)

    acc_ref[...] += jnp.dot(x_ref[...], w_ref[...],
                            preferred_element_type=jnp.float32)

    @pl.when(k == pl.num_programs(2) - 1)
    def _():
        y = acc_ref[...] + b_ref[...]
        if relu:
            y = jnp.maximum(y, 0.0)
        o_ref[...] = y.astype(o_ref.dtype)


def linear(x2d, w, b, relu=False, out_dtype=jnp.bfloat16):
    if x2d.dtype != jnp.bfloat16:
        x2d = x2d.astype(jnp.bfloat16)
    if w.dtype != jnp.bfloat16:
        w = w.astype(jnp.bfloat16)
    M, K = x2d.shape
    N = w.shape[1]
    tm, pm = _tile_and_pad(M, 512, 16)
    tn, pn = _tile_and_pad(N, 256, 128)
    tk, pk = _tile_and_pad(K, 512, 128)
    if pm or pk:
        x2d = jnp.pad(x2d, ((0, pm), (0, pk)))
    if pk or pn:
        w = jnp.pad(w, ((0, pk), (0, pn)))
    if pn:
        b = jnp.pad(b, (0, pn))
    Mp, Np, Kp = M + pm, N + pn, K + pk

    out = pl.pallas_call(
        functools.partial(_linear_kernel, relu=relu),
        out_shape=jax.ShapeDtypeStruct((Mp, Np), out_dtype),
        grid=(Mp // tm, Np // tn, Kp // tk),
        in_specs=[
            pl.BlockSpec((tm, tk), lambda i, j, k: (i, k)),
            pl.BlockSpec((tk, tn), lambda i, j, k: (k, j)),
            pl.BlockSpec((1, tn), lambda i, j, k: (0, j)),
        ],
        out_specs=pl.BlockSpec((tm, tn), lambda i, j, k: (i, j)),
        scratch_shapes=[pltpu.VMEM((tm, tn), jnp.float32)],
        compiler_params=pltpu.CompilerParams(
            dimension_semantics=("parallel", "parallel", "arbitrary"),
            vmem_limit_bytes=_VMEM_LIMIT),
    )(x2d, w, b.astype(jnp.float32).reshape(1, Np))
    if pm or pn:
        out = out[:M, :N]
    return out


# -----------------------------------------------------------------------------
# Fused:  LayerNorm( residual + (x @ W + b) )       (M-tiled, K-accumulated)
# -----------------------------------------------------------------------------
def _mm_res_ln_kernel(x_ref, w_ref, b_ref, r_ref, g_ref, beta_ref, o_ref, acc_ref,
                      *, eps):
    k = pl.program_id(1)

    @pl.when(k == 0)
    def _():
        acc_ref[...] = jnp.zeros_like(acc_ref)

    acc_ref[...] += jnp.dot(x_ref[...], w_ref[...],
                            preferred_element_type=jnp.float32)

    @pl.when(k == pl.num_programs(1) - 1)
    def _():
        y = acc_ref[...] + b_ref[...] + r_ref[...].astype(jnp.float32)
        mu = jnp.mean(y, axis=-1, keepdims=True)
        var = jnp.mean(jnp.square(y - mu), axis=-1, keepdims=True)
        o_ref[...] = ((y - mu) * jax.lax.rsqrt(var + eps) * g_ref[...]
                      + beta_ref[...]).astype(o_ref.dtype)


def matmul_add_layernorm(x2d, w, b, res2d, gamma, beta, eps=1e-5):
    if x2d.dtype != jnp.bfloat16:
        x2d = x2d.astype(jnp.bfloat16)
    if w.dtype != jnp.bfloat16:
        w = w.astype(jnp.bfloat16)
    M, K = x2d.shape
    N = w.shape[1]                       # N = d_model: kept whole for the LN stats
    tm, pm = _tile_and_pad(M, 512, 16)
    tk, pk = _tile_and_pad(K, 512, 128)
    if pm or pk:
        x2d = jnp.pad(x2d, ((0, pm), (0, pk)))
    if pk:
        w = jnp.pad(w, ((0, pk), (0, 0)))
    if pm:
        res2d = jnp.pad(res2d, ((0, pm), (0, 0)))
    Mp, Kp = M + pm, K + pk

    out = pl.pallas_call(
        functools.partial(_mm_res_ln_kernel, eps=eps),
        out_shape=jax.ShapeDtypeStruct((Mp, N), jnp.bfloat16),
        grid=(Mp // tm, Kp // tk),
        in_specs=[
            pl.BlockSpec((tm, tk), lambda i, k: (i, k)),
            pl.BlockSpec((tk, N), lambda i, k: (k, 0)),
            pl.BlockSpec((1, N), lambda i, k: (0, 0)),
            pl.BlockSpec((tm, N), lambda i, k: (i, 0)),
            pl.BlockSpec((1, N), lambda i, k: (0, 0)),
            pl.BlockSpec((1, N), lambda i, k: (0, 0)),
        ],
        out_specs=pl.BlockSpec((tm, N), lambda i, k: (i, 0)),
        scratch_shapes=[pltpu.VMEM((tm, N), jnp.float32)],
        compiler_params=pltpu.CompilerParams(
            dimension_semantics=("parallel", "arbitrary"),
            vmem_limit_bytes=_VMEM_LIMIT),
    )(x2d, w, b.astype(jnp.float32).reshape(1, N),
      res2d, gamma.reshape(1, N), beta.reshape(1, N))
    if pm:
        out = out[:M]
    return out


# -----------------------------------------------------------------------------
# Flash-style attention, natural (B, S, H*dh) layout (no head transposes).
# Heads are indexed with static lane slices; Sk is tiled with online softmax.
# -----------------------------------------------------------------------------
def _flash_attn_kernel(*refs, scale, causal, has_mask, num_heads, head_dim, tq, tk):
    if has_mask:
        q_ref, k_ref, v_ref, mask_ref, o_ref, m_scr, l_scr, acc_scr = refs
    else:
        q_ref, k_ref, v_ref, o_ref, m_scr, l_scr, acc_scr = refs

    ki = pl.program_id(2)

    @pl.when(ki == 0)
    def _():
        m_scr[...] = jnp.full_like(m_scr, -jnp.inf)
        l_scr[...] = jnp.zeros_like(l_scr)
        acc_scr[...] = jnp.zeros_like(acc_scr)

    q = q_ref[0]                          # (tq, H*dh) bf16
    k = k_ref[0]                          # (tk, H*dh) bf16
    v = v_ref[0]

    if has_mask:
        bias = mask_ref[...]              # (tq, tk) additive f32 (0 / -1e9)
    if causal:
        row = pl.program_id(1) * tq + jax.lax.broadcasted_iota(jnp.int32, (tq, tk), 0)
        col = ki * tk + jax.lax.broadcasted_iota(jnp.int32, (tq, tk), 1)
        future = col > row

    for h in range(num_heads):
        sl = slice(h * head_dim, (h + 1) * head_dim)
        q_h, k_h, v_h = q[:, sl], k[:, sl], v[:, sl]
        s = jax.lax.dot_general(q_h, k_h, (((1,), (1,)), ((), ())),
                                preferred_element_type=jnp.float32) * scale
        if has_mask:
            s = s + bias
        if causal:
            s = jnp.where(future, -1e9, s)

        m_prev = m_scr[h]                                     # (tq, 1)
        m_new = jnp.maximum(m_prev, jnp.max(s, axis=-1, keepdims=True))
        alpha = jnp.exp(m_prev - m_new)
        p = jnp.exp(s - m_new)
        l_scr[h] = alpha * l_scr[h] + jnp.sum(p, axis=-1, keepdims=True)
        acc_scr[h] = alpha * acc_scr[h] + jnp.dot(
            p.astype(v_h.dtype), v_h, preferred_element_type=jnp.float32)
        m_scr[h] = m_new

    @pl.when(ki == pl.num_programs(2) - 1)
    def _():
        outs = [acc_scr[h] * pl.reciprocal(l_scr[h], approx=True)
                for h in range(num_heads)]
        # head-major concat along lanes == torch's transpose(1,2).view(B,-1,D)
        o_ref[0] = jnp.concatenate(outs, axis=-1).astype(o_ref.dtype)


def sdpa(q3, k3, v3, add_mask=None, causal=False, num_heads=1):
    # q3: (B, Sq, D) bf16, k3/v3: (B, Sk, D) bf16, add_mask: (Sq, Sk) additive or None.
    B, Sq, D = q3.shape
    Sk = k3.shape[1]
    dh = D // num_heads
    scale = 1.0 / math.sqrt(dh)
    has_mask = add_mask is not None
    tq = _pick_tile(Sq, 256, 8)
    tk = _pick_tile(Sk, 512, 128)

    in_specs = [
        pl.BlockSpec((1, tq, D), lambda b, qi, ki: (b, qi, 0)),
        pl.BlockSpec((1, tk, D), lambda b, qi, ki: (b, ki, 0)),
        pl.BlockSpec((1, tk, D), lambda b, qi, ki: (b, ki, 0)),
    ]
    args = [q3, k3, v3]
    if has_mask:
        in_specs.append(pl.BlockSpec((tq, tk), lambda b, qi, ki: (qi, ki)))
        args.append(add_mask.astype(jnp.float32))

    return pl.pallas_call(
        functools.partial(_flash_attn_kernel, scale=scale, causal=causal,
                          has_mask=has_mask, num_heads=num_heads,
                          head_dim=dh, tq=tq, tk=tk),
        out_shape=jax.ShapeDtypeStruct((B, Sq, D), jnp.bfloat16),
        grid=(B, Sq // tq, Sk // tk),
        in_specs=in_specs,
        out_specs=pl.BlockSpec((1, tq, D), lambda b, qi, ki: (b, qi, 0)),
        scratch_shapes=[pltpu.VMEM((num_heads, tq, 1), jnp.float32),
                        pltpu.VMEM((num_heads, tq, 1), jnp.float32),
                        pltpu.VMEM((num_heads, tq, dh), jnp.float32)],
        compiler_params=pltpu.CompilerParams(
            dimension_semantics=("parallel", "parallel", "arbitrary"),
            vmem_limit_bytes=_VMEM_LIMIT),
    )(*args)


# -----------------------------------------------------------------------------
# Parameter init (weights stored bf16, QKV / KV pre-fused, fc padded to 128 lanes)
# -----------------------------------------------------------------------------
def _init_linear(key, din, dout):
    k1, k2 = jax.random.split(key)
    bound = 1.0 / math.sqrt(din)
    w = jax.random.uniform(k1, (din, dout), jnp.float32, -bound, bound)
    b = jax.random.uniform(k2, (dout,), jnp.float32, -bound, bound)
    return w, b


def init_mha_params(key, d_model, cross):
    ks = jax.random.split(key, 4)
    wq, bq = _init_linear(ks[0], d_model, d_model)
    wk, bk = _init_linear(ks[1], d_model, d_model)
    wv, bv = _init_linear(ks[2], d_model, d_model)
    wd, bd = _init_linear(ks[3], d_model, d_model)
    p = {"dense_w": wd.astype(jnp.bfloat16), "dense_b": bd}
    if cross:
        p.update(w_q=wq.astype(jnp.bfloat16), b_q=bq,
                 w_kv=jnp.concatenate([wk, wv], axis=1).astype(jnp.bfloat16),
                 b_kv=jnp.concatenate([bk, bv]))
    else:
        p.update(w_qkv=jnp.concatenate([wq, wk, wv], axis=1).astype(jnp.bfloat16),
                 b_qkv=jnp.concatenate([bq, bk, bv]))
    return p


def init_ffn_params(key, d_model, ffn_units):
    k1, k2 = jax.random.split(key)
    w1, b1 = _init_linear(k1, d_model, ffn_units)
    w2, b2 = _init_linear(k2, ffn_units, d_model)
    return {"l1_w": w1.astype(jnp.bfloat16), "l1_b": b1,
            "l2_w": w2.astype(jnp.bfloat16), "l2_b": b2}


def init_ln_params(d_model):
    return {"g": jnp.ones((d_model,), jnp.float32),
            "b": jnp.zeros((d_model,), jnp.float32)}


def init_encoder_layer(key, d_model, num_heads, ffn_units):
    k1, k2 = jax.random.split(key)
    return {"mha": init_mha_params(k1, d_model, cross=False),
            "ffn": init_ffn_params(k2, d_model, ffn_units),
            "ln1": init_ln_params(d_model), "ln2": init_ln_params(d_model)}


def init_decoder_layer(key, d_model, num_heads, ffn_units):
    k1, k2, k3 = jax.random.split(key, 3)
    return {"mha1": init_mha_params(k1, d_model, cross=False),
            "mha2": init_mha_params(k2, d_model, cross=True),
            "ffn": init_ffn_params(k3, d_model, ffn_units),
            "ln1": init_ln_params(d_model), "ln2": init_ln_params(d_model),
            "ln3": init_ln_params(d_model)}


def init_transformer(key, vocab_size, d_model, num_heads, ffn_units, num_layers):
    keys = jax.random.split(key, 2 + 2 * num_layers)
    fw, fb = _init_linear(keys[1], d_model, vocab_size)
    n_pad = _round_up(vocab_size, 128)          # lane-dense final projection
    fw = jnp.pad(fw, ((0, 0), (0, n_pad - vocab_size))).astype(jnp.bfloat16)
    fb = jnp.pad(fb, (0, n_pad - vocab_size))
    return {
        "embedding": 0.02 * jax.random.normal(keys[0], (vocab_size, d_model), jnp.float32),
        "fc_w": fw, "fc_b": fb,
        "enc": [init_encoder_layer(keys[2 + i], d_model, num_heads, ffn_units)
                for i in range(num_layers)],
        "dec": [init_decoder_layer(keys[2 + num_layers + i], d_model, num_heads, ffn_units)
                for i in range(num_layers)],
    }


def positional_encoding(max_len, d_model):
    pos = jnp.arange(max_len, dtype=jnp.float32)[:, None]
    div_term = jnp.exp(jnp.arange(0, d_model, 2, dtype=jnp.float32)
                       * (-math.log(10000.0) / d_model))
    pe = jnp.zeros((max_len, d_model), jnp.float32)
    pe = pe.at[:, 0::2].set(jnp.sin(pos * div_term))
    pe = pe.at[:, 1::2].set(jnp.cos(pos * div_term))
    return pe


# -----------------------------------------------------------------------------
# Forward composition
# -----------------------------------------------------------------------------
def multi_head_attention(params, q_in, kv_in, add_mask, num_heads, *, causal, self_attn):
    """Returns the un-projected attention output as a (B*Sq, D) bf16 slab; the final
    dense projection is fused downstream with the residual + LayerNorm."""
    B, Sq, D = q_in.shape
    Sk = kv_in.shape[1]
    if self_attn:
        qkv = linear(q_in.reshape(-1, D), params["w_qkv"], params["b_qkv"])  # (B*Sq, 3D)
        q2, k2, v2 = qkv[:, :D], qkv[:, D:2 * D], qkv[:, 2 * D:]
    else:
        q2 = linear(q_in.reshape(-1, D), params["w_q"], params["b_q"])
        kv = linear(kv_in.reshape(-1, D), params["w_kv"], params["b_kv"])    # (B*Sk, 2D)
        k2, v2 = kv[:, :D], kv[:, D:]

    attn = sdpa(q2.reshape(B, Sq, D), k2.reshape(B, Sk, D), v2.reshape(B, Sk, D),
                add_mask, causal, num_heads)                                 # (B, Sq, D)
    return attn.reshape(B * Sq, D)


def encoder_layer_forward(p, x, add_mask, num_heads):
    B, S, D = x.shape
    attn = multi_head_attention(p["mha"], x, x, add_mask, num_heads,
                                causal=False, self_attn=True)
    out1 = matmul_add_layernorm(attn, p["mha"]["dense_w"], p["mha"]["dense_b"],
                                x.reshape(-1, D), p["ln1"]["g"], p["ln1"]["b"])
    h = linear(out1, p["ffn"]["l1_w"], p["ffn"]["l1_b"], relu=True)
    out2 = matmul_add_layernorm(h, p["ffn"]["l2_w"], p["ffn"]["l2_b"],
                                out1, p["ln2"]["g"], p["ln2"]["b"])
    return out2.reshape(B, S, D)


def decoder_layer_forward(p, x, enc_out, padding_add_mask, num_heads):
    B, S, D = x.shape
    attn1 = multi_head_attention(p["mha1"], x, x, None, num_heads,
                                 causal=True, self_attn=True)
    out1 = matmul_add_layernorm(attn1, p["mha1"]["dense_w"], p["mha1"]["dense_b"],
                                x.reshape(-1, D), p["ln1"]["g"], p["ln1"]["b"])
    out1_3d = out1.reshape(B, S, D)
    attn2 = multi_head_attention(p["mha2"], out1_3d, enc_out, padding_add_mask,
                                 num_heads, causal=False, self_attn=False)
    out2 = matmul_add_layernorm(attn2, p["mha2"]["dense_w"], p["mha2"]["dense_b"],
                                out1, p["ln2"]["g"], p["ln2"]["b"])
    h = linear(out2, p["ffn"]["l1_w"], p["ffn"]["l1_b"], relu=True)
    out3 = matmul_add_layernorm(h, p["ffn"]["l2_w"], p["ffn"]["l2_b"],
                                out2, p["ln3"]["g"], p["ln3"]["b"])
    return out3.reshape(B, S, D)


def transformer_forward(params, encoder_input, decoder_input, num_heads, max_len,
                        encoder_mask=None, decoder_mask=None):
    # TODO(synk): masks are shared (Sq, Sk) slabs; per-example padding masks would
    #             need a (B, Sq, Sk) mask input to the attention kernel.
    vocab_size, d_model = params["embedding"].shape
    pe = positional_encoding(max_len, d_model)
    enc_add_mask = None if encoder_mask is None else \
        (encoder_mask.astype(jnp.float32) * -1000000000.0)

    # Encoder (embedding gather + PE stay in XLA; single cast to bf16 afterwards)
    enc = jnp.take(params["embedding"], encoder_input, axis=0)
    enc = (enc + pe[None, :enc.shape[1], :]).astype(jnp.bfloat16)
    for layer in params["enc"]:
        enc = encoder_layer_forward(layer, enc, enc_add_mask, num_heads)

    # Decoder (look-ahead mask is generated in-kernel)
    dec = jnp.take(params["embedding"], decoder_input, axis=0)
    dec = (dec + pe[None, :dec.shape[1], :]).astype(jnp.bfloat16)
    for layer in params["dec"]:
        dec = decoder_layer_forward(layer, dec, enc, enc_add_mask, num_heads)

    B, S, D = dec.shape
    logits = linear(dec.reshape(-1, D), params["fc_w"], params["fc_b"],
                    out_dtype=jnp.float32)
    logits = logits[:, :vocab_size]
    return logits.reshape(B, S, vocab_size)


# -----------------------------------------------------------------------------
if __name__ == "__main__":
    vocab_size = 50
    d_model = 32
    num_heads = 4
    ffn_units = 64
    num_layers = 2
    max_len = 16
    batch = 2
    seq = 8

    key = jax.random.PRNGKey(0)
    k_params, k_enc, k_dec = jax.random.split(key, 3)

    params = init_transformer(k_params, vocab_size, d_model, num_heads, ffn_units,
                              num_layers)
    encoder_input = jax.random.randint(k_enc, (batch, seq), 0, vocab_size, dtype=jnp.int32)
    decoder_input = jax.random.randint(k_dec, (batch, seq), 0, vocab_size, dtype=jnp.int32)

    logits = transformer_forward(params, encoder_input, decoder_input, num_heads, max_len)
    logits = jax.block_until_ready(logits)
    assert logits.shape == (batch, seq, vocab_size)
    assert bool(jnp.all(jnp.isfinite(logits)))
    print("KERNEL_OK")
</pallas_src>

<mosaic_0001>
module attributes {stable_mosaic.version = 11 : i64} {
  func.func @_linear_kernel(%arg0: i32, %arg1: i32, %arg2: i32, %arg3: memref<16x32xbf16, #tpu.memory_space<vmem>>, %arg4: memref<32x96xbf16, #tpu.memory_space<vmem>>, %arg5: memref<1x96xf32, #tpu.memory_space<vmem>>, %arg6: memref<16x96xbf16, #tpu.memory_space<vmem>>, %arg7: memref<16x96xf32, #tpu.memory_space<vmem>>) attributes {dimension_semantics = [#tpu.dimension_semantics<parallel>, #tpu.dimension_semantics<parallel>, #tpu.dimension_semantics<arbitrary>], iteration_bounds = array<i64: 1, 1, 1>, scalar_prefetch = 0 : i64, scratch_operands = 1 : i64, tpu.core_type = #tpu.core_type<tc>, window_params = [{transform_indices = @transform_0, window_bounds = array<i64: 16, 32>}, {transform_indices = @transform_1, window_bounds = array<i64: 32, 96>}, {transform_indices = @transform_2, window_bounds = array<i64: 1, 96>}, {transform_indices = @transform_3, window_bounds = array<i64: 16, 96>}]} {
    %c0_i32 = arith.constant 0 : i32
    %0 = arith.cmpi eq, %arg2, %c0_i32 : i32
    %1 = arith.extui %0 : i1 to i32
    %c0_i32_0 = arith.constant 0 : i32
    %2 = arith.cmpi ne, %1, %c0_i32_0 : i32
    scf.if %2 {
      %cst_10 = arith.constant 0.000000e+00 : f32
      %12 = vector.broadcast %cst_10 : f32 to vector<16x96xf32>
      %c0_11 = arith.constant 0 : index
      %c0_12 = arith.constant 0 : index
      %13 = vector.load %arg7[%c0_11, %c0_12] : memref<16x96xf32, #tpu.memory_space<vmem>>, vector<16x96xf32>
      tpu.vector_store %arg7[%c0_11, %c0_12], %12 {strides = array<i32>} : memref<16x96xf32, #tpu.memory_space<vmem>>, vector<16x96xf32>,
    } else {
    }
    %c0 = arith.constant 0 : index
    %c0_1 = arith.constant 0 : index
    %3 = vector.load %arg7[%c0, %c0_1] : memref<16x96xf32, #tpu.memory_space<vmem>>, vector<16x96xf32>
    %c0_2 = arith.constant 0 : index
    %c0_3 = arith.constant 0 : index
    %4 = vector.load %arg3[%c0_2, %c0_3] : memref<16x32xbf16, #tpu.memory_space<vmem>>, vector<16x32xbf16>
    %c0_4 = arith.constant 0 : index
    %c0_5 = arith.constant 0 : index
    %5 = vector.load %arg4[%c0_4, %c0_5] : memref<32x96xbf16, #tpu.memory_space<vmem>>, vector<32x96xbf16>
    %cst = arith.constant dense<0.000000e+00> : vector<16x96xf32>
    %6 = tpu.matmul %4, %5, %cst {dimension_numbers = #tpu.dot_dimension_numbers<[1], [0], [0], [1], [0, 0, 1, 1], [], []>} : vector<16x32xbf16>, vector<32x96xbf16>, vector<16x96xf32> -> vector<16x96xf32>
    %7 = arith.addf %3, %6 : vector<16x96xf32>
    %c0_6 = arith.constant 0 : index
    %c0_7 = arith.constant 0 : index
    %8 = vector.load %arg7[%c0_6, %c0_7] : memref<16x96xf32, #tpu.memory_space<vmem>>, vector<16x96xf32>
    tpu.vector_store %arg7[%c0_6, %c0_7], %7 {strides = array<i32>} : memref<16x96xf32, #tpu.memory_space<vmem>>, vector<16x96xf32>,
    %c0_i32_8 = arith.constant 0 : i32
    %9 = arith.cmpi eq, %arg2, %c0_i32_8 : i32
    %10 = arith.extui %9 : i1 to i32
    %c0_i32_9 = arith.constant 0 : i32
    %11 = arith.cmpi ne, %10, %c0_i32_9 : i32
    scf.if %11 {
      %c0_10 = arith.constant 0 : index
      %c0_11 = arith.constant 0 : index
      %12 = vector.load %arg7[%c0_10, %c0_11] : memref<16x96xf32, #tpu.memory_space<vmem>>, vector<16x96xf32>
      %c0_12 = arith.constant 0 : index
      %c0_13 = arith.constant 0 : index
      %13 = vector.load %arg5[%c0_12, %c0_13] : memref<1x96xf32, #tpu.memory_space<vmem>>, vector<1x96xf32>
      %14 = vector.broadcast %13 : vector<1x96xf32> to vector<16x96xf32>
      %15 = arith.addf %12, %14 : vector<16x96xf32>
      %16 = arith.truncf %15 : vector<16x96xf32> to vector<16x96xbf16>
      %c0_14 = arith.constant 0 : index
      %c0_15 = arith.constant 0 : index
      %17 = vector.load %arg6[%c0_14, %c0_15] : memref<16x96xbf16, #tpu.memory_space<vmem>>, vector<16x96xbf16>
      tpu.vector_store %arg6[%c0_14, %c0_15], %16 {strides = array<i32>} : memref<16x96xbf16, #tpu.memory_space<vmem>>, vector<16x96xbf16>,
    } else {
    }
    return
  }
  func.func @transform_0(%arg0: i32, %arg1: i32, %arg2: i32) -> (i32, i32) {
    %c0_i32 = arith.constant 0 : i32
    return %arg0, %arg2 : i32, i32
  }
  func.func @transform_1(%arg0: i32, %arg1: i32, %arg2: i32) -> (i32, i32) {
    %c0_i32 = arith.constant 0 : i32
    return %arg2, %arg1 : i32, i32
  }
  func.func @transform_2(%arg0: i32, %arg1: i32, %arg2: i32) -> (i32, i32) {
    %c0_i32 = arith.constant 0 : i32
    %c0_i32_0 = arith.constant 0 : i32
    return %c0_i32, %arg1 : i32, i32
  }
  func.func @transform_3(%arg0: i32, %arg1: i32, %arg2: i32) -> (i32, i32) {
    %c0_i32 = arith.constant 0 : i32
    return %arg0, %arg1 : i32, i32
  }
}

</mosaic_0001>

<bundles_post_ra>
// kernel: tpu_custom_call.1
= control target key start
LH: loop header
LB: loop body
LE: loop exit
PB: predicated region body
PF: predicated region fallthrough
CT: control target
= control target key end

     0   :  { %8 = vsyncpa [#allocation4], 0  ;;  %s317_s0 = inlined_call_operand.hbm [shape: bf16[16,32], index: 0, kind: input, shape index: {}]   ;;  %s318_s1 = inlined_call_operand.hbm [shape: bf16[32,96], index: 1, kind: input, shape index: {}]   ;;  %s319_s2 = inlined_call_operand.vmem [shape: f32[1,96], index: 2, kind: input, shape index: {}]   ;;  %s320_s3 = inlined_call_operand.hbm [shape: bf16[16,96], index: 3, kind: output, shape index: {}]  }
   0x1   :  { %9 = vsyncpa [#allocation7], 0 }
   0x2   :  { %10 = vsyncpa [#allocation5], 0  ;;  %s265_s12 = smov [#allocation3]  }
   0x3   :  { %s16_s13 = sshll.u32 %s265_s12, 4  ;;  %s17_s13 = int_to_ptr.vmem [resolvable:$true] %s16_s13 }
   0x4   :  { %s207_s14 = scalar_lea.vmem %s17_s13, 128  ;;  %p212_p1 = scmp.lt.s32.totalorder %s17_s13, %s17_s13 }
   0x5   :  { %p208_p0 = scmp.ne.s32.totalorder %s17_s13, %s207_s14  ;;  %p213_p2 = scmp.lt.s32.totalorder %s207_s14, %s207_s14 }
   0x7   :  { %p214_p3 = por %p213_p2, %p212_p1 }
   0x9   :  { %p215_p4 = pnand %p214_p3, %p208_p0 }
   0xb   :  { %218 = shalt.err (!%p215_p4)
}
   0xc   :  { %s266_s15 = smov 64   ;;  %s267_s16 = smov 4  }
   0xd   :  { %22 = dma.hbm_to_vmem [thread:$0]  %s317_s0, 128, %s17_s13, [#allocation4], %s266_s15, %s266_s15, %s267_s16  }
   0xe   :  { %s268_s19 = smov [#allocation6]  }
   0xf   :  { %s28_s20 = sshll.u32 %s268_s19, 4  ;;  %s29_s20 = int_to_ptr.vmem [resolvable:$true] %s28_s20 }
  0x10   :  { %s227_s21 = scalar_lea.vmem %s29_s20, 256  ;;  %p232_p6 = scmp.lt.s32.totalorder %s29_s20, %s29_s20 }
  0x11   :  { %p228_p5 = scmp.ne.s32.totalorder %s29_s20, %s227_s21  ;;  %p233_p7 = scmp.lt.s32.totalorder %s227_s21, %s227_s21 }
  0x13   :  { %p234_p8 = por %p233_p7, %p232_p6 }
  0x15   :  { %p235_p9 = pnand %p234_p8, %p228_p5 }
  0x17   :  { %238 = shalt.err (!%p235_p9)
}
  0x18   :  { %34 = dma.hbm_to_vmem [thread:$0]  %s318_s1, 256, %s29_s20, [#allocation7], %s266_s15, %s266_s15, %s267_s16  }
  0x19   :  { %259 = dma.done.wait [#allocation4], 128  }
  0x1a   :  { %260 = vsyncadd [#allocation4], 4294967168 }
  0x1b   :  { %261 = dma.done.wait [#allocation7], 256  }
  0x1c   :  { %262 = vsyncadd [#allocation7], 4294967040  ;;  %vm48_vm0 = vcmask 785408   ;;  %v269_v0 = vmov 0.0   ;;  %vm270_vm1 = vmmov 0   ;;  %v196_v1 = vld [vmem:[#allocation6 + $0x8] sm:$0xff]  }
  0x1d   :  { %49 = vst.msk [vmem:[#allocation2] sm:$0xff] %vm48_vm0, %v269_v0  ;;  %50 = vst.msk [vmem:[#allocation2 + $0x8] sm:$0xff] %vm48_vm0, %v269_v0  ;;  %181 = vmatprep.subr.bf16.mxu0 %v269_v0  ;;  %185 = vmatprep.mubr.msk.bf16.mxu0 %vm270_vm1, %v269_v0  ;;  %v197_v2 = vld [vmem:[#allocation6] sm:$0xff]   ;;  %v198_v3 = vld [vmem:[#allocation3] sm:$0xff]   ;;  %vm76_vm2 = vcmask 261120   ;;  %vm148_vm3 = vcmask 781312  }
  0x1e   :  { %182 = vmatpush3.bf16.msra.mxu0 %v196_v1  ;;  %v173_v12 = vld [vmem:[%s319_s2] ss:$0 sm:$0xff]  ;;  %s271_s24 = smov [#allocation8]  }
  0x1f   :  { %183 = vmatprep.subr.bf16.mxu0 %v269_v0  ;;  %s156_s25 = sshll.u32 %s271_s24, 4  ;;  %s157_s25 = int_to_ptr.vmem [resolvable:$true] %s156_s25 }
  0x20   :  { %s239_s26 = scalar_lea.vmem %s157_s25, 128  ;;  %p244_p11 = scmp.lt.s32.totalorder %s157_s25, %s157_s25 }
  0x21   :  { %p240_p10 = scmp.ne.s32.totalorder %s157_s25, %s239_s26  ;;  %p245_p12 = scmp.lt.s32.totalorder %s239_s26, %s239_s26 }
  0x22   :  { %184 = vmatpush3.bf16.msra.mxu0 %v197_v2 }
  0x23   :  { %p246_p13 = por %p245_p12, %p244_p11 }
  0x24   :  { %v51_v4 = vld [vmem:[#allocation2] sm:$0xff]  ;;  %v52_v8 = vld [vmem:[#allocation2 + $0x8] sm:$0xff] }
  0x25   :  { %186 = vmatmul.mubr.msk.bf16.vlgmr.msra.gmra.mxu0 %vm76_vm2, %v198_v3  ;;  %p247_p0 = pnand %p246_p13, %p240_p10 }
  0xe5   :  { %v114_v5 = vpop.f32.mrf.mxu0 }
  0xe6   :  { %v121_v6 = vadd.f32 %v114_v5, %v51_v4 }
  0xe7   :  { %v187_v7 = vpop.f32.mrf.mxu0 }
  0xe8   :  { %124 = vst.msk [vmem:[#allocation2] sm:$0xff] %vm48_vm0, %v121_v6 }
  0xe9   :  { %v117_v9 = vpop.f32.mrf.mxu0 }
  0xea   :  { %v122_v10 = vadd.f32 %v117_v9, %v52_v8 }
  0xeb   :  { %v188_v11 = vpop.f32.mrf.mxu0 }
  0xec   :  { %125 = vst.msk [vmem:[#allocation2 + $0x8] sm:$0xff] %vm48_vm0, %v122_v10 }
  0xef   :  { %v129_v13 = vld [vmem:[#allocation2] sm:$0xff] }
  0xf0   :  { %v138_v14 = vadd.f32 %v173_v12, %v129_v13 }
  0xf2   :  { %v176_v15 = vpack.c.bf16 %v138_v14, %v138_v14 }
  0xf3   :  { %v130_v16 = vld [vmem:[#allocation2 + $0x8] sm:$0xff] }
  0xf4   :  { %v139_v17 = vadd.f32 %v173_v12, %v130_v16  ;;  %149 = vst.msk [vmem:[#allocation8] sm:$0xf] %vm148_vm3, %v176_v15 }
  0xf6   :  { %v177_v18 = vpack.c.bf16 %v139_v17, %v139_v17 }
  0xf8   :  { %150 = vst.msk [vmem:[#allocation8 + $0x4] sm:$0xf] %vm148_vm3, %v177_v18 }
  0xf9   :  { %250 = shalt.err (!%p247_p0)
}
  0xfa   :  { %162 = dma.vmem_to_hbm [thread:$0]  %s157_s25, 128, %s320_s3, [#allocation5], %s266_s15, %s266_s15, %s267_s16  }
  0xfb   :  { %263 = dma.done.wait [#allocation5], 128  }
  0xfc   :  { %264 = vsyncadd [#allocation5], 4294967168 }
  0xfd   :  { %166 = vsyncpa [#allocation4], 1 }
  0xfe   :  { %167 = vsyncpa [#allocation7], 1 }
  0xff   :  { %168 = vsyncpa [#allocation5], 1 }

</bundles_post_ra>
